<compile_context>
chip_gen: v7x
topology: tpu7x:2x2x1
jax: 0.10.0
libtpu: 0.0.40
codegen_flags: <defaults>
</compile_context>

<pallas_src>
import numpy as np
import jax
import jax.numpy as jnp
from jax.experimental import pallas as pl
from jax.experimental.pallas import tpu as pltpu


# ----------------------------- glue: sizes & weights -----------------------------

def _round_up(x, m):
    return (x + m - 1) // m * m


def _ceil_div(a, b):
    return -(-a // b)


def resize_shortest_edge_shape(h, w, short_edge_length, max_size):
    """detectron2 ResizeShortestEdge.get_output_shape semantics."""
    scale = short_edge_length * 1.0 / min(h, w)
    if h < w:
        newh, neww = short_edge_length, scale * w
    else:
        newh, neww = scale * h, short_edge_length
    if max(newh, neww) > max_size:
        s = max_size * 1.0 / max(newh, neww)
        newh *= s
        neww *= s
    return int(newh + 0.5), int(neww + 0.5)


def bilinear_matrix(out_size, in_size):
    """(out_size, in_size) half-pixel bilinear interpolation weights."""
    dst = np.arange(out_size, dtype=np.float64)
    src = np.clip((dst + 0.5) * (in_size / out_size) - 0.5, 0.0, in_size - 1)
    i0 = np.floor(src).astype(np.int64)
    i1 = np.minimum(i0 + 1, in_size - 1)
    w1 = (src - i0).astype(np.float32)
    w0 = 1.0 - w1
    mat = np.zeros((out_size, in_size), dtype=np.float32)
    mat[np.arange(out_size), i0] += w0
    mat[np.arange(out_size), i1] += w1
    return mat


# --------------------------------- Pallas kernels ---------------------------------

def _rows_first_kernel(img_ref, rh_ref, rwt_ref, out_ref, imgbf_ref):
    # img_ref : (H, W)          uint8, one channel (flip folded into index_map)
    # rh_ref  : (TM, H)         bf16 row-interp weight tile
    # rwt_ref : (W, newW_pad)   bf16 col-interp weights (transposed), lane-padded
    # out_ref : (TM, newW_pad)  f32
    # imgbf_ref: (H, W)         bf16 scratch — per-channel cached cast
    @pl.when(pl.program_id(1) == 0)
    def _():
        imgbf_ref[...] = img_ref[...].astype(jnp.bfloat16)   # once per channel
    tmp = jnp.dot(rh_ref[...], imgbf_ref[...], preferred_element_type=jnp.float32)
    out_ref[...] = jnp.dot(tmp.astype(jnp.bfloat16), rwt_ref[...],
                           preferred_element_type=jnp.float32)


def _cols_first_kernel(img_ref, rh_ref, rwt_ref, out_ref, tmpbf_ref):
    # Per channel (ti == 0): tmp = img_bf16 @ RW^T cached in VMEM scratch.
    # Per row tile:          out = RH_tile @ tmp_bf16.
    @pl.when(pl.program_id(1) == 0)
    def _():
        img_bf = img_ref[...].astype(jnp.bfloat16)
        tmp = jnp.dot(img_bf, rwt_ref[...], preferred_element_type=jnp.float32)
        tmpbf_ref[...] = tmp.astype(jnp.bfloat16)
    out_ref[...] = jnp.dot(rh_ref[...], tmpbf_ref[...],
                           preferred_element_type=jnp.float32)


# --------------------------------- wrapper ---------------------------------------

def _pick_vmem_limit(block_bytes):
    """Per-generation VMEM ceiling with headroom (v7x 64MiB phys -> 56MiB cap,
    v5e/v6e 128MiB phys -> 104MiB cap)."""
    try:
        phys = int(pltpu.get_tpu_info().vmem_capacity_bytes)
    except Exception:
        phys = 64 * 2**20
    cap = 56 * 2**20 if phys <= 64 * 2**20 else 104 * 2**20
    return int(min(cap, max(block_bytes + (4 << 20), 16 << 20)))


def _constant_block_spec(shape):
    """BlockSpec for a grid-invariant operand; single-buffer it when supported
    (double-buffering a constant block is pure VMEM waste)."""
    idx = lambda ci, ti: (0, 0)
    try:
        return pl.BlockSpec(shape, idx, pipeline_mode=pl.Buffered(1))
    except (AttributeError, TypeError):
        return pl.BlockSpec(shape, idx)


def preprocess_image(image_hwc_u8, *, short_edge_length=800, max_size=1333,
                     input_format="RGB", order="auto"):
    """Reproduces run_inference's preprocessing:
         image[:, :, ::-1] (if RGB) -> ResizeShortestEdge -> float32 CHW tensor.
       Returns (chw_float32, height, width) matching the inputs-dict fields."""
    h, w, c = image_hwc_u8.shape
    newh, neww = resize_shortest_edge_shape(h, w, short_edge_length, max_size)

    # Lane-dense output width; minimal sublane-aligned row tiling (no tm=256 waste).
    neww_p = _round_up(neww, 128)
    n_tiles = max(1, _ceil_div(newh, 256))
    tm = _round_up(_ceil_div(newh, n_tiles), 8)
    newh_p = _round_up(newh, tm)
    n_row_tiles = newh_p // tm

    rh_np = np.zeros((newh_p, h), dtype=np.float32)
    rh_np[:newh] = bilinear_matrix(newh, h)
    rwt_np = np.zeros((w, neww_p), dtype=np.float32)
    rwt_np[:, :neww] = bilinear_matrix(neww, w).T
    rh = jnp.asarray(rh_np, dtype=jnp.bfloat16)      # (newH_pad, H)
    rwt = jnp.asarray(rwt_np, dtype=jnp.bfloat16)    # (W, newW_pad)

    # glue: HWC -> CHW on uint8 (no f32 materialization in HBM)
    # TODO(synk): if the image decoder can emit CHW uint8 directly, this extra
    #             HBM pass vanishes.
    img_chw = jnp.transpose(image_hwc_u8, (2, 0, 1))  # (C, H, W) uint8
    flip = (input_format == "RGB")                    # image[:, :, ::-1] semantics

    # Choose the cheaper contraction order for this image shape.
    flops_rows = c * (2 * newh_p * h * w + 2 * newh_p * w * neww_p)
    flops_cols = c * (2 * h * w * neww_p + 2 * newh_p * h * neww_p)
    if order == "auto":
        rows_first = flops_rows <= flops_cols
    elif order == "rows":
        rows_first = True
    elif order == "cols":
        rows_first = False
    else:
        raise ValueError(order)

    if rows_first:
        kernel = _rows_first_kernel
        scratch_shapes = [pltpu.VMEM((h, w), jnp.bfloat16)]       # cached bf16 channel
        flops = flops_rows
        block_bytes = (2 * h * w                 # img u8 block  x2 buffers
                       + 2 * h * w               # bf16 image scratch
                       + 2 * 2 * tm * h          # rh bf16 block x2
                       + 2 * w * neww_p          # rwt bf16 block x1 (single-buffered)
                       + 2 * 4 * tm * neww_p     # out f32 block x2
                       + 4 * tm * w              # per-tile tmp (f32)
                       + 2 * tm * w)             # per-tile tmp bf16 recast
    else:
        kernel = _cols_first_kernel
        scratch_shapes = [pltpu.VMEM((h, neww_p), jnp.bfloat16)]  # cached img @ RW^T
        flops = flops_cols
        block_bytes = (2 * h * w                 # img u8 block  x2 buffers
                       + 2 * h * neww_p          # bf16 tmp scratch
                       + 2 * h * w               # transient bf16 image (ti==0)
                       + 4 * h * neww_p          # transient f32 tmp   (ti==0)
                       + 2 * 2 * tm * h          # rh bf16 block x2
                       + 2 * w * neww_p          # rwt bf16 block x1
                       + 2 * 4 * tm * neww_p     # out f32 block x2
                       + 4 * tm * neww_p)        # per-tile f32 result before store

    bytes_accessed = (c * h * w                        # uint8 image
                      + 2 * (newh_p * h + w * neww_p)  # bf16 weights
                      + 4 * c * newh_p * neww_p)       # f32 output
    vmem_limit = _pick_vmem_limit(block_bytes)

    ch_idx = ((lambda ci, ti: (c - 1 - ci, 0, 0)) if flip
              else (lambda ci, ti: (ci, 0, 0)))

    out = pl.pallas_call(
        kernel,
        out_shape=jax.ShapeDtypeStruct((c, newh_p, neww_p), jnp.float32),
        grid_spec=pltpu.PrefetchScalarGridSpec(
            num_scalar_prefetch=0,
            grid=(c, n_row_tiles),
            in_specs=[
                pl.BlockSpec((None, h, w), ch_idx),          # channel flip in index_map
                pl.BlockSpec((tm, h), lambda ci, ti: (ti, 0)),
                _constant_block_spec((w, neww_p)),           # grid-invariant weights
            ],
            out_specs=pl.BlockSpec((None, tm, neww_p), lambda ci, ti: (ci, ti, 0)),
            scratch_shapes=scratch_shapes,
        ),
        compiler_params=pltpu.CompilerParams(
            # channel axis parallel (megacore on v7x); row-tile axis must be
            # sequential for the per-channel scratch cache.
            dimension_semantics=("parallel", "arbitrary"),
            vmem_limit_bytes=vmem_limit),
        cost_estimate=pl.CostEstimate(flops=flops, transcendentals=0,
                                      bytes_accessed=bytes_accessed),
    )(img_chw, rh, rwt)

    # glue: strip residual row/lane padding only if any exists
    if newh_p != newh or neww_p != neww:
        out = out[:, :newh, :neww]
    return out, h, w


# ------------------------------------- main --------------------------------------

if __name__ == "__main__":
    key = jax.random.PRNGKey(0)
    H, W, C = 16, 24, 3
    # synthetic "BGR" uint8 image, as read_image(path, format='BGR') would produce
    image = jax.random.randint(key, (H, W, C), 0, 256, dtype=jnp.int32).astype(jnp.uint8)

    # small config consistent with ResizeShortestEdge semantics (scaled-down 800/1333)
    SHORT_EDGE, MAX_SIZE = 8, 16

    # pure-JAX f32 reference of the same math (flip -> bilinear matmuls -> CHW f32)
    newh, neww = resize_shortest_edge_shape(H, W, SHORT_EDGE, MAX_SIZE)
    rh_ref = jnp.asarray(bilinear_matrix(newh, H))
    rwt_ref = jnp.asarray(bilinear_matrix(neww, W).T)
    ref_img = jnp.transpose(image.astype(jnp.float32), (2, 0, 1))[::-1]
    ref = jnp.einsum("oh,chw,wn->con", rh_ref, ref_img, rwt_ref)

    # exercise the auto-selected order plus both explicit kernel variants
    for order in ("auto", "rows", "cols"):
        chw, height, width = preprocess_image(
            image, short_edge_length=SHORT_EDGE, max_size=MAX_SIZE,
            input_format="RGB", order=order)
        chw = jax.block_until_ready(chw)

        assert chw.shape == (C, newh, neww), (order, chw.shape)
        assert chw.dtype == jnp.float32
        assert (height, width) == (H, W)
        # bf16 MXU path: expect ~1-2 LSB of error on the 0..255 pixel scale
        np.testing.assert_allclose(np.asarray(chw), np.asarray(ref),
                                   rtol=0.02, atol=2.0)

    print("KERNEL_OK")
</pallas_src>

<mosaic_0001>
module attributes {stable_mosaic.version = 11 : i64} {
  func.func @_rows_first_kernel(%arg0: i32, %arg1: i32, %arg2: memref<1x16x24xi8, #tpu.memory_space<vmem>>, %arg3: memref<8x16xbf16, #tpu.memory_space<vmem>>, %arg4: memref<24x128xbf16, #tpu.memory_space<vmem>>, %arg5: memref<1x8x128xf32, #tpu.memory_space<vmem>>, %arg6: memref<16x24xbf16, #tpu.memory_space<vmem>>) attributes {dimension_semantics = [#tpu.dimension_semantics<parallel>, #tpu.dimension_semantics<arbitrary>], iteration_bounds = array<i64: 3, 1>, scalar_prefetch = 0 : i64, scratch_operands = 1 : i64, tpu.core_type = #tpu.core_type<tc>, window_params = [{transform_indices = @transform_0, window_bounds = array<i64: 1, 16, 24>}, {transform_indices = @transform_1, window_bounds = array<i64: 8, 16>}, {pipeline_mode = #tpu.pipeline_mode<synchronous>, transform_indices = @transform_2, window_bounds = array<i64: 24, 128>}, {transform_indices = @transform_3, window_bounds = array<i64: 1, 8, 128>}]} {
    %c0_i32 = arith.constant 0 : i32
    %0 = arith.cmpi eq, %arg1, %c0_i32 : i32
    %1 = arith.extui %0 : i1 to i32
    %c0_i32_0 = arith.constant 0 : i32
    %2 = arith.cmpi ne, %1, %c0_i32_0 : i32
    scf.if %2 {
      %c0_10 = arith.constant 0 : index
      %c0_11 = arith.constant 0 : index
      %c0_12 = arith.constant 0 : index
      %12 = vector.load %arg2[%c0_10, %c0_11, %c0_12] : memref<1x16x24xi8, #tpu.memory_space<vmem>>, vector<1x16x24xi8>
      %13 = vector.shape_cast %12 : vector<1x16x24xi8> to vector<16x24xi8>
      %14 = arith.uitofp %13 : vector<16x24xi8> to vector<16x24xbf16>
      %c0_13 = arith.constant 0 : index
      %c0_14 = arith.constant 0 : index
      %15 = vector.load %arg6[%c0_13, %c0_14] : memref<16x24xbf16, #tpu.memory_space<vmem>>, vector<16x24xbf16>
      tpu.vector_store %arg6[%c0_13, %c0_14], %14 {strides = array<i32>} : memref<16x24xbf16, #tpu.memory_space<vmem>>, vector<16x24xbf16>,
    } else {
    }
    %c0 = arith.constant 0 : index
    %c0_1 = arith.constant 0 : index
    %3 = vector.load %arg3[%c0, %c0_1] : memref<8x16xbf16, #tpu.memory_space<vmem>>, vector<8x16xbf16>
    %c0_2 = arith.constant 0 : index
    %c0_3 = arith.constant 0 : index
    %4 = vector.load %arg6[%c0_2, %c0_3] : memref<16x24xbf16, #tpu.memory_space<vmem>>, vector<16x24xbf16>
    %cst = arith.constant dense<0.000000e+00> : vector<8x24xf32>
    %5 = tpu.matmul %3, %4, %cst {dimension_numbers = #tpu.dot_dimension_numbers<[1], [0], [0], [1], [0, 0, 1, 1], [], []>} : vector<8x16xbf16>, vector<16x24xbf16>, vector<8x24xf32> -> vector<8x24xf32>
    %6 = arith.truncf %5 : vector<8x24xf32> to vector<8x24xbf16>
    %c0_4 = arith.constant 0 : index
    %c0_5 = arith.constant 0 : index
    %7 = vector.load %arg4[%c0_4, %c0_5] : memref<24x128xbf16, #tpu.memory_space<vmem>>, vector<24x128xbf16>
    %cst_6 = arith.constant dense<0.000000e+00> : vector<8x128xf32>
    %8 = tpu.matmul %6, %7, %cst_6 {dimension_numbers = #tpu.dot_dimension_numbers<[1], [0], [0], [1], [0, 0, 1, 1], [], []>} : vector<8x24xbf16>, vector<24x128xbf16>, vector<8x128xf32> -> vector<8x128xf32>
    %c0_7 = arith.constant 0 : index
    %c0_8 = arith.constant 0 : index
    %c0_9 = arith.constant 0 : index
    %9 = vector.load %arg5[%c0_7, %c0_8, %c0_9] : memref<1x8x128xf32, #tpu.memory_space<vmem>>, vector<1x8x128xf32>
    %10 = vector.shape_cast %9 : vector<1x8x128xf32> to vector<8x128xf32>
    %11 = vector.shape_cast %8 : vector<8x128xf32> to vector<1x8x128xf32>
    tpu.vector_store %arg5[%c0_7, %c0_8, %c0_9], %11 {strides = array<i32>} : memref<1x8x128xf32, #tpu.memory_space<vmem>>, vector<1x8x128xf32>,
    return
  }
  func.func @transform_0(%arg0: i32, %arg1: i32) -> (i32, i32, i32) {
    %c2_i32 = arith.constant 2 : i32
    %0 = arith.subi %c2_i32, %arg0 : i32
    %c0_i32 = arith.constant 0 : i32
    %c0_i32_0 = arith.constant 0 : i32
    %c0_i32_1 = arith.constant 0 : i32
    return %0, %c0_i32, %c0_i32_0 : i32, i32, i32
  }
  func.func @transform_1(%arg0: i32, %arg1: i32) -> (i32, i32) {
    %c0_i32 = arith.constant 0 : i32
    %c0_i32_0 = arith.constant 0 : i32
    return %arg1, %c0_i32 : i32, i32
  }
  func.func @transform_2(%arg0: i32, %arg1: i32) -> (i32, i32) {
    %c0_i32 = arith.constant 0 : i32
    %c0_i32_0 = arith.constant 0 : i32
    %c0_i32_1 = arith.constant 0 : i32
    return %c0_i32, %c0_i32_0 : i32, i32
  }
  func.func @transform_3(%arg0: i32, %arg1: i32) -> (i32, i32, i32) {
    %c0_i32 = arith.constant 0 : i32
    %c0_i32_0 = arith.constant 0 : i32
    return %arg0, %arg1, %c0_i32 : i32, i32, i32
  }
}

</mosaic_0001>

<bundles_post_ra>
// kernel: tpu_custom_call.1
= control target key start
LH: loop header
LB: loop body
LE: loop exit
PB: predicated region body
PF: predicated region fallthrough
CT: control target
= control target key end

     0   :  { %s1139_s0 = inlined_call_operand.hbm [shape: u8[3,16,24], index: 0, kind: input, shape index: {}]   ;;  %s1140_s1 = inlined_call_operand.hbm [shape: bf16[8,16], index: 1, kind: input, shape index: {}]   ;;  %s1141_s2 = inlined_call_operand.hbm [shape: bf16[24,128], index: 2, kind: input, shape index: {}]   ;;  %s1142_s3 = inlined_call_operand.hbm [shape: f32[3,8,128], index: 3, kind: output, shape index: {}]  }
   0x1   :  { %1150 = sst [smem:[#allocation14_spill]] %s1140_s1 }
   0x2   :  { %1151 = sst [smem:[#allocation15_spill]] %s1141_s2 }
   0x3   :  { %8 = vsyncpa [#allocation4], 0 }
   0x4   :  { %10 = vsyncpa [#allocation4 + $0x1], 0 }
   0x5   :  { %11 = vsyncpa [#allocation7], 0 }
   0x6   :  { %12 = vsyncpa [#allocation5], 0 }
   0x7   :  { %14 = vsyncpa [#allocation5 + $0x1], 0  ;;  %s867_s12 = smov 0   ;;  %s869_s13 = smov 0  }
   0x8   :  { %s871_s14 = smov 0   ;;  %s873_s15 = smov 0  }
   0x9   :  { %s875_s16 = smov 0   ;;  %s877_s17 = smov 0  }
   0xa   :  { %s879_s18 = smov 0   ;;  %s881_s19 = smov 0  }
   0xb   :  { %s883_s20 = smov 0  }
   0xc LB: > { %s481_s21 = sadd.s32 4294967295, %s835_s20   ;;  %s482_s22 = sadd.s32 4294967294, %s835_s20   ;;  %s835_s20 = sphi %s883_s20, %s20_s20   ;;  %s831_s19 = sphi %s881_s19, %s1178_s19   ;;  %s827_s18 = sphi %s879_s18, %s1177_s18   ;;  %s823_s17 = sphi %s877_s17, %s1176_s17   ;;  %s819_s16 = sphi %s875_s16, %s1175_s16   ;;  %s815_s15 = sphi %s873_s15, %s1174_s15   ;;  %s811_s14 = sphi %s871_s14, %s1173_s14   ;;  %s807_s13 = sphi %s869_s13, %s1172_s13   ;;  %s803_s12 = sphi %s867_s12, %s1171_s12  }
   0xd   : > { %p48_p0 = scmp.ne.s32.totalorder %s823_s17, %s819_s16  ;;  %p49_p1 = scmp.eq.s32.totalorder %s835_s20, 0 }
   0xe   : > { %p54_p2 = scmp.ne.s32.totalorder %s819_s16, %s815_s15  ;;  %p916_p3 = scmp.eq.s32.totalorder %s481_s21, 0 }
   0xf   : > { %p920_p4 = por %p49_p1, %p48_p0  ;;  %p126_p6 = scmp.ne.s32.totalorder %s811_s14, %s807_s13 }
  0x10   : > { %s1152_s23 = scalar_select %p916_p3, 1, 0 }
  0x11   : > { %p927_p5 = por %p916_p3, %p54_p2  ;;  %p127_p7 = scmp.eq.s32.totalorder %s481_s21, 2 }
  0x12   : > { %p132_p8 = scmp.ne.s32.totalorder %s807_s13, %s803_s12  ;;  %p133_p9 = scmp.eq.s32.totalorder %s482_s22, 2 }
  0x13   : > { %s1154_s26 = scalar_select %p927_p5, 1, 0 }
  0x14   : > { %p483_p10 = scmp.ge.s32.totalorder %s835_s20, 1  ;;  %p936_p11 = por %p127_p7, %p126_p6 }
  0x15   : > { %p140_p12 = scmp.lt.s32.totalorder %s835_s20, 4  ;;  %p941_p13 = por %p133_p9, %p132_p8 }
  0x16   : > { %s1155_s27 = scalar_select %p936_p11, 1, 0 }
  0x17   : > { %s1156_s28 = scalar_select %p941_p13, 1, 0 }
  0x18   : > { %p945_p0 = pnand %p483_p10, %p140_p12  ;;  %s837_s30 = smov [#allocation6]  }
  0x19   : > { %1157 = sst [smem:[#allocation13_spill]] %s1156_s28  ;;  %s155_s4 = sshll.u32 %s837_s30, 4  ;;  %s156_s4 = int_to_ptr.vmem [resolvable:$true] %s155_s4 }
  0x1a   : > { %s1158_s29 = scalar_select %p945_p0, 1, 0 }
  0x1b   : > { %p536_p1 = pneg %p945_p0  ;;  %p553_p2 = scmp.lt.s32.totalorder %s835_s20, 3 }
  0x1c   : > { %s838_s6 = smov [#allocation8]   ;;  %s1161_s1 = sld [smem:[#allocation14_spill]] }
  0x1d   : > { %p954_p6 = pnand %p536_p1, %p916_p3  ;;  %s165_s7 = sshll.u32 %s838_s6, 4  ;;  %s964_s7 = int_to_ptr.vmem [resolvable:$true] %s165_s7 }
  0x1e   : > { %p960_p7 = pnand %p553_p2, %p920_p4 }
  0x1f   : > { %p641_p9 = pneg %p954_p6 }
  0x20   : > { %s1160_s8 = scalar_select %p960_p7, 1, 0 }
  0x22   : > { %s639_s11 = scalar_lea.hbm %s1161_s1, 64 }
  0x23   : > { %p640_p8 = scmp.ne.s32.totalorder %s1161_s1, %s639_s11  ;;  %p646_p4 = scmp.lt.u32.totalorder %s639_s11, %s1161_s1 }
  0x25   : > { %p642_p10 = pnand %p641_p9, %p640_p8 }
  0x27   : > { %p643_p12 = pneg %p642_p10 }
  0x29   : > { %p648_p1 = pnand %p646_p4, %p643_p12 }
  0x2b   : > { %651 = shalt.err (!%p648_p1)
}
  0x2c   : > { %s652_s30 = scalar_lea.vmem %s156_s4, 64  ;;  %p660_p3 = scmp.lt.s32.totalorder %s156_s4, %s156_s4 }
  0x2d   : > { %p653_p2 = scmp.ne.s32.totalorder %s156_s4, %s652_s30  ;;  %p661_p5 = scmp.lt.s32.totalorder %s652_s30, %s652_s30 }
  0x2f   : > { %p655_p13 = pnand %p653_p2, %p641_p9  ;;  %p662_p0 = por %p661_p5, %p660_p3 }
  0x31   : > { %p656_p11 = pneg %p655_p13 }
  0x33   : > { %p663_p7 = pnand %p662_p0, %p656_p11 }
  0x35   : > { %666 = shalt.err (!%p663_p7)
}
  0x36   : > { %539 = dma.hbm_to_vmem [thread:$0]  (!%p954_p6), %s1161_s1, 64, %s156_s4, [#allocation7]  }
  0x37   : > { %s1162_s2 = sld [smem:[#allocation15_spill]] }
  0x3d   : > { %s667_s15 = scalar_lea.hbm %s1162_s2, 192 }
  0x3e   : > { %p668_p13 = scmp.ne.s32.totalorder %s1162_s2, %s667_s15  ;;  %p674_p11 = scmp.lt.u32.totalorder %s667_s15, %s1162_s2 }
  0x40   : > { %p670_p3 = pnand %p668_p13, %p641_p9 }
  0x42   : > { %p671_p5 = pneg %p670_p3 }
  0x44   : > { %p676_p0 = pnand %p674_p11, %p671_p5 }
  0x46   : > { %679 = shalt.err (!%p676_p0)
}
  0x47   : > { %s680_s4 = scalar_lea.vmem %s964_s7, 192  ;;  %p688_p12 = scmp.lt.s32.totalorder %s964_s7, %s964_s7 }
  0x48   : > { %p681_p7 = scmp.ne.s32.totalorder %s964_s7, %s680_s4  ;;  %p689_p4 = scmp.lt.s32.totalorder %s680_s4, %s680_s4 }
  0x4a   : > { %p683_p8 = pnand %p681_p7, %p641_p9  ;;  %p690_p1 = por %p689_p4, %p688_p12 }
  0x4c   : > { %p684_p10 = pneg %p683_p8 }
  0x4e   : > { %p691_p2 = pnand %p690_p1, %p684_p10 }
  0x50   : > { %694 = shalt.err (!%p691_p2)
}
  0x51   : > { %s839_s6 = smov 64   ;;  %s840_s9 = smov 4  }
  0x52   : > { %542 = dma.hbm_to_vmem [thread:$0]  (!%p954_p6), %s1162_s2, 192, %s964_s7, [#allocation7], %s839_s6, %s839_s6, %s840_s9  }
  0x53   : > { %s41_s15 = sadd.s32 1, %s823_s17  ;;  %s179_s21 = sand.u32 1, %s823_s17  }
  0x54   : > { %s32_s22 = sadd.s32 1, %s831_s19  ;;  %s36_s24 = ssub.s32 2, %s831_s19 }
  0x55   : > { %p34_p9 = scmp.ge.s32.totalorder %s32_s22, 3  ;;  %s487_s30 = sshll.u32 %s179_s21, 2 }
  0x56   : > { %s504_s4 = sshll.u32 %s36_s24, 6  ;;  %s183_s10 = scalar_lea.vmem [#allocation3], %s487_s30 }
  0x57   : > { %s1180_s22 = smov (%p34_p9, %s32_s22), 0  ;;  %s1022_s5 = scalar_lea.hbm %s1139_s0, %s504_s4 }
  0x58   : > { %s37_s7 = ssub.s32 2, %s1180_s22  ;;  %s111_s6 = ssub.s32 %s831_s19, %s1180_s22 }
  0x59   : > { %s38_s9 = ssub.s32 %s36_s24, %s37_s7  ;;  %p114_p6 = scmp.eq.s32.totalorder %s111_s6, 0 }
  0x5a   : > { %p39_p13 = scmp.eq.s32.totalorder %s38_s9, 0  ;;  %s191_s11 = sshll.u32 %s183_s10, 4  ;;  %s1035_s11 = int_to_ptr.vmem [resolvable:$true] %s191_s11 }
  0x5b   : > { %s1163_s2 = sadd.s32 1, %s811_s14  ;;  %s1037_s25 = scalar_lea.sflag [#allocation4], %s179_s21 }
  0x5c   : > { %s1030_s28 = scalar_select %p114_p6, %s811_s14, %s1163_s2  }
  0x5d   : > { %s1033_s1 = scalar_select %p39_p13, %s823_s17, %s41_s15  }
  0x5e   : > { %s695_s4 = scalar_lea.hbm %s1022_s5, 64  ;;  %p1164_p5 = scmp.ne.s32.totalorder %s1160_s8, 0 }
  0x5f   : > { %p696_p3 = scmp.ne.s32.totalorder %s1022_s5, %s695_s4  ;;  %s700_s7 = scalar_lea.hbm %s1139_s0, 192 }
  0x60   : > { %p697_p11 = pneg %p1164_p5  ;;  %p701_p8 = scmp.lt.u32.totalorder %s1022_s5, %s1139_s0 }
  0x61   : > { %p702_p10 = scmp.lt.u32.totalorder %s700_s7, %s695_s4  ;;  %p704_p4 = scmp.lt.u32.totalorder %s695_s4, %s1022_s5 }
  0x62   : > { %p698_p0 = pnand %p697_p11, %p696_p3 }
  0x63   : > { %p703_p12 = por %p702_p10, %p701_p8 }
  0x64   : > { %p699_p7 = pneg %p698_p0 }
  0x65   : > { %p705_p1 = por %p704_p4, %p703_p12 }
  0x67   : > { %p706_p2 = pnand %p705_p1, %p699_p7 }
  0x69   : > { %709 = shalt.err (!%p706_p2)
}
  0x6a   : > { %s710_s15 = scalar_lea.vmem %s1035_s11, 64  ;;  %s841_s21 = smov [#allocation3]  }
  0x6b   : > { %p711_p9 = scmp.ne.s32.totalorder %s1035_s11, %s710_s15  ;;  %s715_s9 = sshll.u32 %s841_s21, 4  ;;  %s716_s9 = int_to_ptr.vmem [resolvable:$false] %s715_s9 }
  0x6c   : > { %s717_s10 = scalar_lea.vmem %s716_s9, 128  ;;  %p718_p3 = scmp.lt.s32.totalorder %s1035_s11, %s716_s9 }
  0x6d   : > { %p713_p6 = pnand %p711_p9, %p697_p11  ;;  %p719_p0 = scmp.lt.s32.totalorder %s717_s10, %s710_s15 }
  0x6f   : > { %p714_p13 = pneg %p713_p6  ;;  %p720_p8 = por %p719_p0, %p718_p3 }
  0x71   : > { %p721_p10 = pnand %p720_p8, %p714_p13 }
  0x73   : > { %724 = shalt.err (!%p721_p10)
}
  0x74   : > { %s842_s4 = smov 32   ;;  %s843_s24 = smov 2  }
  0x75   : > { %546 = dma.hbm_to_vmem [thread:$0]  (!%p1164_p5), %s1022_s5, 64, %s1035_s11, %s1037_s25, %s842_s4, %s842_s4, %s843_s24  }
  0x76   : > { %p1165_p11 = scmp.ne.s32.totalorder %s1158_s29, 0 }
  0x77   : > { %s205_s30 = sand.u32 (!%p1165_p11), 1, %s819_s16   ;;  %p1166_p7 = scmp.ne.s32.totalorder (!%p1165_p11), %s1154_s26, 0 }
  0x78   : > { %203 = sbr.rel (%p1165_p11) target bundleno = 589 (0x24d), region = 32  ;;  %s491_s7 = sshll.u32 (!%p1165_p11), %s205_s30, 2 }
  0x79   : > { %s206_s2 = scalar_lea.sflag (!%p1165_p11), [#allocation4], %s205_s30  ;;  %s209_s6 = scalar_lea.vmem (!%p1165_p11), [#allocation3], %s491_s7 }
  0x7f   : > { %790 = dma.done.wait (%p1166_p7), %s206_s2, 64  }
  0x80   : > { %792 = vsyncadd (%p1166_p7), %s206_s2, 4294967232  ;;  %p1167_p12 = scmp.ne.s32.totalorder %s1152_s23, 0 }
  0x82   : > { %794 = dma.done.wait (%p1167_p12), [#allocation7], 256  }
  0x83   : > { %796 = vsyncadd (%p1167_p12), [#allocation7], 4294967040  ;;  %v844_v0 = vmov 0.0   ;;  %vm845_vm0 = vmmov 0   ;;  %v246_v1 = vld [vmem:[%s209_s6] sm:$0x3] }
  0x84   : > { %510 = vmatprep.subr.bf16.mxu0 %v844_v0  ;;  %512 = vmatprep.mubr.msk.bf16.mxu0 %vm845_vm0, %v844_v0  ;;  %v247_v2 = vld [vmem:[%s209_s6 + $0x2] sm:$0x3]  ;;  %v248_v3 = vunpack.c.l.u8.bf16 %v246_v1  ;;  %v637_v5 = vld [vmem:[#allocation8] sm:$0xff]   ;;  %vm256_vm1 = vcmask 195584   ;;  %v258_v8 = vld [vmem:[#allocation6] sm:$0xf] }
  0x85   : > { %516 = vmatprep.subr.bf16.mxu1 %v844_v0  ;;  %520 = vmatprep.mubr.msk.bf16.mxu1 %vm845_vm0, %v844_v0  ;;  %v249_v4 = vunpack.c.l.u8.bf16 %v247_v2  ;;  %vm260_vm2 = vcmask 130048   ;;  %v638_v9 = vld [vmem:[#allocation8 + $0x8] ss:$0 sps:$4 sm:$0xff]   ;;  %vm321_vm3 = vcmask 1043456   ;;  %s237_s23 = sand.u32 1, %s807_s13   ;;  %s501_s5 = sshll.u32 %s827_s18, 7 }
  0x86   : > { %517 = vmatpush3.bf16.msra.mxu1 %v637_v5  ;;  %v323_v10 = vsel %vm321_vm3, %v638_v9, 0  ;;  %s494_s26 = sshll.u32 %s237_s23, 3  ;;  %s1085_s15 = scalar_lea.hbm %s1142_s3, %s501_s5 }
  0x87   : > { %v495_v6 = vcombine.low %v248_v3, %v249_v4  ;;  %518 = vmatprep.subr.bf16.mxu1 %v844_v0  ;;  %s239_s29 = scalar_lea.vmem [#allocation9], %s494_s26  ;;  %s367_s21 = scalar_lea.sflag [#allocation5], %s237_s23 }
  0x88   : > { %s381_s8 = sshll.u32 %s239_s29, 4  ;;  %p1168_p4 = scmp.ne.s32.totalorder %s1155_s27, 0  ;;  %s1080_s8 = int_to_ptr.vmem [resolvable:$true] %s381_s8 }
  0x89   : > { %257 = vst.msk [vmem:[#allocation2] sm:$0xff] %vm256_vm1, %v495_v6  ;;  %s725_s9 = scalar_lea.vmem %s1080_s8, 128  ;;  %s846_s18 = smov [#allocation9]  }
  0x8a   : > { %519 = vmatpush3.bf16.msra.mxu1 %v323_v10  ;;  %p726_p5 = scmp.ne.s32.totalorder %s1080_s8, %s725_s9  ;;  %s729_s10 = sshll.u32 %s846_s18, 4  ;;  %s730_s10 = int_to_ptr.vmem [resolvable:$false] %s729_s10 }
  0x8b   : > { %s731_s4 = scalar_lea.vmem %s730_s10, 256  ;;  %p732_p9 = scmp.lt.s32.totalorder %s1080_s8, %s730_s10 }
  0x8c   : > { %p727_p1 = pnand %p726_p5, %p1168_p4  ;;  %p733_p6 = scmp.lt.s32.totalorder %s731_s4, %s725_s9 }
  0x8e   : > { %p728_p2 = pneg %p727_p1  ;;  %p734_p13 = por %p733_p6, %p732_p9 }
  0x90   : > { %v259_v7 = vld [vmem:[#allocation2] sm:$0xff]  ;;  %p735_p3 = pnand %p734_p13, %p728_p2 }
  0x91   : > { %511 = vmatpush3.bf16.msra.mxu0 %v259_v7 }
  0x94   : > { %513 = vmatmul.mubr.msk.bf16.vlgmr.msra.gmra.mrb[0].mxu0 %vm260_vm2, %v258_v8 }
 0x167   : > { %v298_v11 = vpop.f32.mrb[0].mxu0 }
 0x168   : > { %v304_v12 = vpack.c.bf16 %v298_v11, %v298_v11  ;;  %v514_v13 = vpop.f32.mrb[1].mxu0 }
 0x169   : > { %v301_v14 = vpop.f32.mrb[2].mxu0 }
 0x16a   : > { %v515_v15 = vpop.f32.mrb[3].mxu0  ;;  %521 = vmatmul.mubr.msk.bf16.vlgmr.msra.gmra.mrb[0].mxu1 %vm256_vm1, %v304_v12 }
 0x23d   : > { %v359_v16 = vpop.f32.mrb[0].mxu1 }
 0x23e   : > { %365 = vst [vmem:[%s239_s29] sm:$0xff] %v359_v16  ;;  %v522_v17 = vpop.f32.mrb[1].mxu1 }
 0x23f   : > { %v362_v18 = vpop.f32.mrb[2].mxu1 }
 0x240   : > { %738 = shalt.err (!%p735_p3)
}
 0x241   : > { %s739_s24 = scalar_lea.hbm %s1085_s15, 128  ;;  %s743_s2 = scalar_lea.hbm %s1142_s3, 384 }
 0x242   : > { %p740_p0 = scmp.ne.s32.totalorder %s1085_s15, %s739_s24  ;;  %p744_p11 = scmp.lt.u32.totalorder %s1085_s15, %s1142_s3 }
 0x243   : > { %p745_p7 = scmp.lt.u32.totalorder %s743_s2, %s739_s24  ;;  %p747_p5 = scmp.lt.u32.totalorder %s739_s24, %s1085_s15 }
 0x244   : > { %p741_p8 = pnand %p740_p0, %p1168_p4 }
 0x245   : > { %p746_p12 = por %p745_p7, %p744_p11 }
 0x246   : > { %p742_p10 = pneg %p741_p8 }
 0x247   : > { %p748_p1 = por %p747_p5, %p746_p12 }
 0x249   : > { %p749_p2 = pnand %p748_p1, %p742_p10 }
 0x24b   : > { %752 = shalt.err (!%p749_p2)
}
 0x24c   : > { %534 = dma.vmem_to_hbm [thread:$0]  (%p1168_p4), %s1080_s8, 128, %s1085_s15, %s367_s21   ;;  %v523_v19 = vpop.f32.mrb[3].mxu1 }
 0x24d PF: > { %s1169_s26 = sld [smem:[#allocation13_spill]]  ;;  %p556_p9 = scmp.ge.s32.totalorder %s835_s20, 2 }
 0x24e   : > { %s393_s29 = sand.u32 1, %s803_s12  }
 0x24f   : > { %s394_s5 = scalar_lea.sflag [#allocation5], %s393_s29 }
 0x253   : > { %p1170_p6 = scmp.ne.s32.totalorder %s1169_s26, 0 }
 0x255   : > { %p548_p13 = pnand %p556_p9, %p1170_p6 }
 0x257   : > { %798 = dma.done.wait (!%p548_p13), %s394_s5, 128  }
 0x258   : > { %800 = vsyncadd (!%p548_p13), %s394_s5, 4294967168  ;;  %s20_s20 = sadd.s32 1, %s835_s20   ;;  %s1171_s12 = smov %s807_s13 }
 0x259   : > { %p17_p3 = scmp.ge.s32.totalorder %s20_s20, 5   ;;  %s1172_s13 = smov %s811_s14 }
 0x25a   : > { %s1173_s14 = smov %s1030_s28  ;;  %s1174_s15 = smov %s819_s16 }
 0x25b   : > { %s1175_s16 = smov %s823_s17  ;;  %s1176_s17 = smov %s1033_s1 }
 0x25c   : > { %s1177_s18 = smov %s831_s19  ;;  %s1178_s19 = smov %s1180_s22 }
 0x25d   :  { %19 = sbr.rel (!%p17_p3) target bundleno = 12 (0xc), region = 90 }
 0x264   :  { %399 = vsyncpa [#allocation4], 1 }
 0x265   :  { %401 = vsyncpa [#allocation4 + $0x1], 1 }
 0x266   :  { %402 = vsyncpa [#allocation7], 1 }
 0x267   :  { %403 = vsyncpa [#allocation5], 1 }
 0x268   :  { %405 = vsyncpa [#allocation5 + $0x1], 1 }

</bundles_post_ra>
